<compile_context>
chip_gen: v7x
topology: tpu7x:2x2x1
jax: 0.10.0
libtpu: 0.0.40
codegen_flags: <defaults>
</compile_context>

<pallas_src>
import functools

import numpy as np

import jax
import jax.numpy as jnp
from jax import lax
from jax.experimental import pallas as pl
from jax.experimental.pallas import tpu as pltpu

_LANE = 128


def _round_up(x, m):
    return (x + m - 1) // m * m


def _vmem_cap_bytes():
    """Generation-aware VMEM ceiling (v5e/v6e: 128 MiB, v7x: 64 MiB physical)."""
    cap = 64 * 1024 * 1024
    try:
        cap = int(getattr(pltpu.get_tpu_info(), "vmem_capacity_bytes", cap))
    except Exception:
        pass
    return max(int(cap * 0.8), 32 * 1024 * 1024)


def _choose_block_n(n, d):
    """Rows per streamed weight tile -> (block_n, k_steps, n_padded)."""
    if n * d * 4 <= (8 << 20):
        return n, 1, n                 # whole table as a single full-extent tile
    # ~2-4 MiB tiles amortise the ~0.35us per-grid-step overhead.
    target = _round_up(max(256, min(4096, (4 << 20) // (d * 4))), 8)
    for bn in range(target, 255, -8):
        if n % bn == 0:
            return bn, n // bn, n
    # No decent divisor: pad the table rows instead of degenerating to a tiny
    # tile (padded rows are never selected by the one-hot, they contribute 0).
    n_padded = _round_up(n, target)
    return target, n_padded // target, n_padded


def _stream_vmem_bytes(block_n, d, b_pad, l):
    """Streaming-path VMEM budget incl. lane padding and matmul intermediates."""
    w_tile = 2 * block_n * d * 4                      # double-buffered weight tile
    out_blk = 2 * b_pad * d * 4                       # double-buffered output block
    idx_blk = 2 * _round_up(l, 8) * _LANE * 4         # (L,1) i32, lane-padded to 128
    se_blk = 4 * _round_up(b_pad, 8) * _LANE * 4      # starts / ends blocks
    member = _round_up(b_pad, 8) * _round_up(l, _LANE) * 4        # f32 scratch
    onehot = _round_up(l, 16) * _round_up(block_n, _LANE) * 2     # bf16 intermediate
    counts = _round_up(b_pad, 8) * _round_up(block_n, _LANE) * 4
    return w_tile + out_blk + idx_blk + se_blk + member + onehot + counts


def _gather_vmem_bytes(chunk_rows, d, b_pad):
    gbuf = 2 * chunk_rows * d * 4                     # double-buffered row chunks
    out_blk = 2 * b_pad * d * 4
    se_blk = 4 * _round_up(b_pad, 8) * _LANE * 4
    member = _round_up(b_pad, 8) * _round_up(chunk_rows, _LANE) * 4
    return gbuf + out_blk + se_blk + member


def _vmem_limit(budget, cap):
    return int(min(cap, max(32 << 20, int(budget * 1.5) + (2 << 20))))


# ----------------------------------------------------------------------------
# Streaming (small-table / dense-usage) path.
# ----------------------------------------------------------------------------
def _streaming_kernel(idx_ref, starts_ref, ends_ref, w_ref, out_ref, member_ref):
    """One grid step = (table t, row-tile k); the table streams tile-by-tile.

    idx_ref    : VMEM (L, 1)     i32  nnz row indices of table t
    starts_ref : VMEM (B_pad, 1) i32  bag start positions (padded bags empty)
    ends_ref   : VMEM (B_pad, 1) i32  bag end positions
    w_ref      : VMEM (tn, D)    f32  rows [k*tn, (k+1)*tn) of table t
    out_ref    : VMEM (B_pad, D) f32  pooled bags, resident across k
    member_ref : VMEM (B_pad, L) f32  scratch, k-invariant bag membership
    """
    k = pl.program_id(1)
    b_pad = out_ref.shape[0]
    l = idx_ref.shape[0]
    tn = w_ref.shape[0]

    @pl.when(k == 0)
    def _():
        out_ref[...] = jnp.zeros_like(out_ref)
        # member[b, j] = 1 iff nnz position j belongs to bag b.  It does not
        # depend on k, so build it once per table and keep it in VMEM scratch.
        j_iota = lax.broadcasted_iota(jnp.int32, (b_pad, l), 1)
        member_ref[...] = jnp.logical_and(
            j_iota >= starts_ref[...], j_iota < ends_ref[...]
        ).astype(member_ref.dtype)

    # onehot[j, n] = 1 iff indices[j] == global row k*tn + n.  The k*tn shift is
    # folded into the small (L, 1) index column instead of the (L, tn) iota.
    # Out-of-range / padded rows are simply never selected.
    shifted_idx = idx_ref[...] - k * tn                       # (L, 1)
    n_iota = lax.broadcasted_iota(jnp.int32, (l, tn), 1)      # (L, tn)
    onehot = (n_iota == shifted_idx).astype(jnp.bfloat16)

    # counts[b, n] = multiplicity of row k*tn+n inside bag b.  bf16 0/1 operands
    # hit the native MXU rate; accumulation is f32, so counts stay exact ints.
    counts = jnp.dot(member_ref[...].astype(jnp.bfloat16), onehot,
                     preferred_element_type=jnp.float32)
    # Second dot keeps the f32 weights untouched (bit-exact pooling).
    out_ref[...] += jnp.dot(counts, w_ref[...],
                            preferred_element_type=jnp.float32)


def _forward_stream(weights, indices, starts, ends, b_pad, block_n, vmem_cap):
    T, N, D = weights.shape
    L = indices.shape[1]

    if block_n is None:
        block_n, k_steps, n_padded = _choose_block_n(N, D)
    elif block_n >= N:
        block_n, k_steps, n_padded = N, 1, N
    else:
        block_n = _round_up(max(block_n, 8), 8)
        k_steps = -(-N // block_n)
        n_padded = block_n * k_steps

    if n_padded > N:
        weights = jnp.pad(weights, ((0, 0), (0, n_padded - N), (0, 0)))

    idx_col = indices[..., None]                      # (T, L, 1)
    limit = _vmem_limit(_stream_vmem_bytes(block_n, D, b_pad, L), vmem_cap)

    return pl.pallas_call(
        _streaming_kernel,
        out_shape=jax.ShapeDtypeStruct((T, b_pad, D), jnp.float32),
        grid_spec=pltpu.PrefetchScalarGridSpec(
            num_scalar_prefetch=0,
            grid=(T, k_steps),                  # tables parallel, row tiles reduce
            in_specs=[
                pl.BlockSpec((None, L, 1), lambda t, k: (t, 0, 0)),
                pl.BlockSpec((None, b_pad, 1), lambda t, k: (t, 0, 0)),
                pl.BlockSpec((None, b_pad, 1), lambda t, k: (t, 0, 0)),
                pl.BlockSpec((None, block_n, D), lambda t, k: (t, k, 0)),
            ],
            out_specs=pl.BlockSpec((None, b_pad, D), lambda t, k: (t, 0, 0)),
            scratch_shapes=[pltpu.VMEM((b_pad, L), jnp.float32)],
        ),
        compiler_params=pltpu.CompilerParams(
            dimension_semantics=("parallel", "arbitrary"),
            vmem_limit_bytes=limit),
    )(idx_col, starts, ends, weights)


# ----------------------------------------------------------------------------
# Gather (large-table, N >> L) path.
# ----------------------------------------------------------------------------
def _make_gather_kernel(n_idx, chunk_rows, n_chunks, last_len):
    """Gather-path kernel with static chunking parameters baked in.

    Kernel refs:
      idx_smem   : SMEM (T, L)      i32  scalar-prefetched nnz row indices
      starts/ends: VMEM (B_pad, 1)  i32  per-table bag ranges (padded bags empty)
      w_hbm      : ANY  (T, N, D)   f32  merged tables, left in HBM
      out_ref    : VMEM (B_pad, D)  f32  pooled bags for table t
      gbuf       : VMEM (2, C, D)   f32  double-buffered gathered-row chunks
      sem        : DMA sems (2,)
    """
    last_slot = (n_chunks - 1) % 2

    def kernel(idx_smem, starts_ref, ends_ref, w_hbm, out_ref, gbuf, sem):
        t = pl.program_id(0)
        b_pad, d = out_ref.shape

        def chunk_dma(c, slot, start):
            """Issue (start=True) or drain the per-row DMAs of chunk c."""
            base = c * chunk_rows

            def body(j, carry):
                @pl.when(base + j < n_idx)
                def _():
                    row = idx_smem[t, base + j]
                    cp = pltpu.make_async_copy(
                        w_hbm.at[t, pl.ds(row, 1), :],
                        gbuf.at[slot, pl.ds(j, 1), :],
                        sem.at[slot])
                    if start:
                        cp.start()
                    else:
                        cp.wait()
                return carry

            lax.fori_loop(0, chunk_rows, body, 0)

        out_ref[...] = jnp.zeros_like(out_ref)
        chunk_dma(0, 0, True)                        # prime chunk 0

        @pl.loop(0, n_chunks)
        def _(c):
            slot = c % 2
            chunk_dma(c, slot, False)                # wait for this chunk's rows

            # Prefetch the next chunk into the other buffer while pooling this
            # one (all of a chunk's row DMAs are kept in flight together).
            @pl.when(c + 1 < n_chunks)
            def _():
                chunk_dma(c + 1, 1 - slot, True)

            if last_len < chunk_rows:
                # Tail rows of the final chunk are never DMA'd during this grid
                # step; zero them (post-drain, nothing outstanding on this slot)
                # so member==0 columns never multiply uninitialised VMEM.
                @pl.when(c == n_chunks - 1)
                def _():
                    gbuf[last_slot, last_len:, :] = jnp.zeros(
                        (chunk_rows - last_len, d), jnp.float32)

            # member[b, j] = 1 iff global nnz position base+j belongs to bag b.
            base = c * chunk_rows
            j_iota = lax.broadcasted_iota(jnp.int32, (b_pad, chunk_rows), 1) + base
            member = jnp.logical_and(
                j_iota >= starts_ref[...], j_iota < ends_ref[...]
            ).astype(jnp.float32)
            out_ref[...] += jnp.dot(member, gbuf[slot],
                                    preferred_element_type=jnp.float32)

    return kernel


def _forward_gather(weights, indices, starts, ends, b_pad, chunk_rows, vmem_cap):
    T, N, D = weights.shape
    L = indices.shape[1]
    if chunk_rows is None:
        chunk_rows = 4096
    chunk_rows = max(8, _round_up(min(chunk_rows, _round_up(L, 8)), 8))
    n_chunks = -(-L // chunk_rows)
    last_len = L - (n_chunks - 1) * chunk_rows

    kernel = _make_gather_kernel(L, chunk_rows, n_chunks, last_len)
    limit = _vmem_limit(_gather_vmem_bytes(chunk_rows, D, b_pad), vmem_cap)

    return pl.pallas_call(
        kernel,
        out_shape=jax.ShapeDtypeStruct((T, b_pad, D), jnp.float32),
        grid_spec=pltpu.PrefetchScalarGridSpec(
            num_scalar_prefetch=1,                   # indices -> SMEM
            grid=(T,),
            in_specs=[
                pl.BlockSpec((None, b_pad, 1), lambda t, idx: (t, 0, 0)),
                pl.BlockSpec((None, b_pad, 1), lambda t, idx: (t, 0, 0)),
                pl.BlockSpec(memory_space=pl.ANY),   # weights stay in HBM
            ],
            out_specs=pl.BlockSpec((None, b_pad, D), lambda t, idx: (t, 0, 0)),
            scratch_shapes=[
                pltpu.VMEM((2, chunk_rows, D), jnp.float32),
                pltpu.SemaphoreType.DMA((2,)),
            ],
        ),
        compiler_params=pltpu.CompilerParams(
            dimension_semantics=("parallel",),       # tables across TCs (v7x)
            vmem_limit_bytes=limit),
    )(indices, starts, ends, weights)


# ----------------------------------------------------------------------------
# Public entry point.
# ----------------------------------------------------------------------------
@functools.partial(jax.jit, static_argnames=("block_n", "chunk_rows", "force_path"))
def merged_embeddingbag_sgd_forward(weights, indices, offsets, *,
                                    block_n=None, chunk_rows=None, force_path=None):
    """weights [T,N,D] f32, indices [T,L] i32, offsets [T,B+1] i32 -> [T,B,D] f32.

    Out-of-range / negative indices are silently dropped (contribute zero);
    PyTorch's EmbeddingBag would raise instead.
    """
    T, N, D = weights.shape
    L = indices.shape[1]
    B = offsets.shape[1] - 1
    b_pad = _round_up(B, 8)                          # sublane-dense output block
    # TODO(synk): pad D to a multiple of 128 for lane-dense stores when the real
    #             embedding dim is e.g. 64 or 96; the demo uses D=128 already.

    weights = weights.astype(jnp.float32)
    indices = indices.astype(jnp.int32)
    offsets = offsets.astype(jnp.int32)

    starts = offsets[:, :B]
    ends = offsets[:, 1:B + 1]
    pad = b_pad - B
    if pad:
        zpad = jnp.zeros((T, pad), jnp.int32)
        starts = jnp.concatenate([starts, zpad], axis=1)   # padded bags are empty
        ends = jnp.concatenate([ends, zpad], axis=1)
    starts = starts[..., None]                        # (T, b_pad, 1)
    ends = ends[..., None]                            # (T, b_pad, 1)

    vmem_cap = _vmem_cap_bytes()

    if force_path is None:
        # Gather pays off when the table is big and mostly untouched: streamed
        # bytes ~ N*D*4 per table vs gathered ~ L*D*4 (+ per-row DMA overhead,
        # budgeted as 2x).
        use_gather = (N * D * 4 > (2 << 20)) and (2 * L < N)
    else:
        use_gather = force_path == "gather"

    if use_gather:
        out_pad = _forward_gather(weights, indices, starts, ends,
                                  b_pad, chunk_rows, vmem_cap)
    else:
        # TODO(synk): for very large L the (L, 1) index operand lane-pads to
        #             L*512 B of VMEM; repack lane-dense or prefer the gather path.
        out_pad = _forward_stream(weights, indices, starts, ends,
                                  b_pad, block_n, vmem_cap)
    return out_pad[:, :B, :]


def _ref_forward(weights, indices, offsets):
    weights = np.asarray(weights)
    indices = np.asarray(indices)
    offsets = np.asarray(offsets)
    T, _, D = weights.shape
    B = offsets.shape[1] - 1
    out = np.zeros((T, B, D), np.float32)
    for t in range(T):
        for b in range(B):
            for j in range(offsets[t, b], offsets[t, b + 1]):
                out[t, b] += weights[t, indices[t, j]]
    return out


if __name__ == "__main__":
    key = jax.random.PRNGKey(0)
    kw, ki, ko, kw2, ki2, ko2 = jax.random.split(key, 6)

    # Case A: small merged tables (streaming path by default).
    T, N, D = 3, 64, 128     # tables, rows per table, embedding dim
    B, L = 4, 16             # bags (batch), nnz indices per table
    weights = jax.random.normal(kw, (T, N, D), dtype=jnp.float32)   # EmbeddingBag init N(0,1)
    indices = jax.random.randint(ki, (T, L), 0, N, dtype=jnp.int32)
    cuts = jnp.sort(jax.random.randint(ko, (T, B - 1), 0, L + 1, dtype=jnp.int32), axis=1)
    offsets = jnp.concatenate(
        [jnp.zeros((T, 1), jnp.int32), cuts, jnp.full((T, 1), L, jnp.int32)], axis=1)
    ref = _ref_forward(weights, indices, offsets)

    # 1) streaming path, single full-extent tile.
    out = jax.block_until_ready(merged_embeddingbag_sgd_forward(weights, indices, offsets))
    np.testing.assert_allclose(np.asarray(out), ref, rtol=1e-5, atol=1e-5)

    # 2) streaming path with several row tiles (resident accumulator + hoisted member).
    out = jax.block_until_ready(
        merged_embeddingbag_sgd_forward(weights, indices, offsets, block_n=16))
    np.testing.assert_allclose(np.asarray(out), ref, rtol=1e-5, atol=1e-5)

    # 3) gather path, two full chunks (double-buffered per-row DMA gather).
    out = jax.block_until_ready(
        merged_embeddingbag_sgd_forward(weights, indices, offsets,
                                        force_path="gather", chunk_rows=8))
    np.testing.assert_allclose(np.asarray(out), ref, rtol=1e-5, atol=1e-5)

    # Case B: gather path with a ragged final chunk (tail zeroing, odd #chunks).
    T2, N2, D2, B2, L2 = 2, 96, 128, 5, 20
    weights2 = jax.random.normal(kw2, (T2, N2, D2), dtype=jnp.float32)
    indices2 = jax.random.randint(ki2, (T2, L2), 0, N2, dtype=jnp.int32)
    cuts2 = jnp.sort(jax.random.randint(ko2, (T2, B2 - 1), 0, L2 + 1, dtype=jnp.int32), axis=1)
    offsets2 = jnp.concatenate(
        [jnp.zeros((T2, 1), jnp.int32), cuts2, jnp.full((T2, 1), L2, jnp.int32)], axis=1)
    ref2 = _ref_forward(weights2, indices2, offsets2)
    out2 = jax.block_until_ready(
        merged_embeddingbag_sgd_forward(weights2, indices2, offsets2,
                                        force_path="gather", chunk_rows=8))
    np.testing.assert_allclose(np.asarray(out2), ref2, rtol=1e-5, atol=1e-5)

    # The PyTorch module returns a list of [B, D] tensors (one per table).
    per_table = [out[t] for t in range(T)]
    assert len(per_table) == T and per_table[0].shape == (B, D)

    print("KERNEL_OK")
</pallas_src>

<mosaic_0001>
module attributes {stable_mosaic.version = 11 : i64} {
  func.func @_streaming_kernel(%arg0: i32, %arg1: i32, %arg2: memref<1x16x1xi32, #tpu.memory_space<vmem>>, %arg3: memref<1x8x1xi32, #tpu.memory_space<vmem>>, %arg4: memref<1x8x1xi32, #tpu.memory_space<vmem>>, %arg5: memref<1x64x128xf32, #tpu.memory_space<vmem>>, %arg6: memref<1x8x128xf32, #tpu.memory_space<vmem>>, %arg7: memref<8x16xf32, #tpu.memory_space<vmem>>) attributes {dimension_semantics = [#tpu.dimension_semantics<parallel>, #tpu.dimension_semantics<arbitrary>], iteration_bounds = array<i64: 3, 1>, scalar_prefetch = 0 : i64, scratch_operands = 1 : i64, tpu.core_type = #tpu.core_type<tc>, window_params = [{transform_indices = @transform_0, window_bounds = array<i64: 1, 16, 1>}, {transform_indices = @transform_1, window_bounds = array<i64: 1, 8, 1>}, {transform_indices = @transform_2, window_bounds = array<i64: 1, 8, 1>}, {transform_indices = @transform_3, window_bounds = array<i64: 1, 64, 128>}, {transform_indices = @transform_4, window_bounds = array<i64: 1, 8, 128>}]} {
    %c0_i32 = arith.constant 0 : i32
    %0 = arith.cmpi eq, %arg1, %c0_i32 : i32
    %1 = arith.extui %0 : i1 to i32
    %c0_i32_0 = arith.constant 0 : i32
    %2 = arith.cmpi ne, %1, %c0_i32_0 : i32
    scf.if %2 {
      %cst_15 = arith.constant 0.000000e+00 : f32
      %26 = vector.broadcast %cst_15 : f32 to vector<8x128xf32>
      %c0_16 = arith.constant 0 : index
      %c0_17 = arith.constant 0 : index
      %c0_18 = arith.constant 0 : index
      %27 = vector.load %arg6[%c0_16, %c0_17, %c0_18] : memref<1x8x128xf32, #tpu.memory_space<vmem>>, vector<1x8x128xf32>
      %28 = vector.shape_cast %27 : vector<1x8x128xf32> to vector<8x128xf32>
      %29 = vector.shape_cast %26 : vector<8x128xf32> to vector<1x8x128xf32>
      tpu.vector_store %arg6[%c0_16, %c0_17, %c0_18], %29 {strides = array<i32>} : memref<1x8x128xf32, #tpu.memory_space<vmem>>, vector<1x8x128xf32>,
      %30 = tpu.iota {dimensions = array<i32: 1>} : vector<8x16xi32>
      %c0_19 = arith.constant 0 : index
      %c0_20 = arith.constant 0 : index
      %c0_21 = arith.constant 0 : index
      %31 = vector.load %arg3[%c0_19, %c0_20, %c0_21] : memref<1x8x1xi32, #tpu.memory_space<vmem>>, vector<1x8x1xi32>
      %32 = vector.shape_cast %31 : vector<1x8x1xi32> to vector<8x1xi32>
      %33 = vector.broadcast %32 : vector<8x1xi32> to vector<8x16xi32>
      %34 = arith.cmpi sge, %30, %33 : vector<8x16xi32>
      %c0_22 = arith.constant 0 : index
      %c0_23 = arith.constant 0 : index
      %c0_24 = arith.constant 0 : index
      %35 = vector.load %arg4[%c0_22, %c0_23, %c0_24] : memref<1x8x1xi32, #tpu.memory_space<vmem>>, vector<1x8x1xi32>
      %36 = vector.shape_cast %35 : vector<1x8x1xi32> to vector<8x1xi32>
      %37 = vector.broadcast %36 : vector<8x1xi32> to vector<8x16xi32>
      %38 = arith.cmpi slt, %30, %37 : vector<8x16xi32>
      %39 = arith.andi %34, %38 : vector<8x16xi1>
      %40 = arith.extui %39 : vector<8x16xi1> to vector<8x16xi32>
      %41 = arith.sitofp %40 : vector<8x16xi32> to vector<8x16xf32>
      %c0_25 = arith.constant 0 : index
      %c0_26 = arith.constant 0 : index
      %42 = vector.load %arg7[%c0_25, %c0_26] : memref<8x16xf32, #tpu.memory_space<vmem>>, vector<8x16xf32>
      tpu.vector_store %arg7[%c0_25, %c0_26], %41 {strides = array<i32>} : memref<8x16xf32, #tpu.memory_space<vmem>>, vector<8x16xf32>,
    } else {
    }
    %c0 = arith.constant 0 : index
    %c0_1 = arith.constant 0 : index
    %c0_2 = arith.constant 0 : index
    %3 = vector.load %arg2[%c0, %c0_1, %c0_2] : memref<1x16x1xi32, #tpu.memory_space<vmem>>, vector<1x16x1xi32>
    %4 = vector.shape_cast %3 : vector<1x16x1xi32> to vector<16x1xi32>
    %c64_i32 = arith.constant 64 : i32
    %5 = arith.muli %arg1, %c64_i32 : i32
    %6 = vector.broadcast %5 : i32 to vector<16x1xi32>
    %7 = arith.subi %4, %6 : vector<16x1xi32>
    %8 = tpu.iota {dimensions = array<i32: 1>} : vector<16x64xi32>
    %9 = vector.broadcast %7 : vector<16x1xi32> to vector<16x64xi32>
    %10 = arith.cmpi eq, %8, %9 : vector<16x64xi32>
    %11 = arith.extui %10 : vector<16x64xi1> to vector<16x64xi32>
    %12 = arith.sitofp %11 : vector<16x64xi32> to vector<16x64xf32>
    %13 = arith.truncf %12 : vector<16x64xf32> to vector<16x64xbf16>
    %c0_3 = arith.constant 0 : index
    %c0_4 = arith.constant 0 : index
    %14 = vector.load %arg7[%c0_3, %c0_4] : memref<8x16xf32, #tpu.memory_space<vmem>>, vector<8x16xf32>
    %15 = arith.truncf %14 : vector<8x16xf32> to vector<8x16xbf16>
    %cst = arith.constant dense<0.000000e+00> : vector<8x64xf32>
    %16 = tpu.matmul %15, %13, %cst {dimension_numbers = #tpu.dot_dimension_numbers<[1], [0], [0], [1], [0, 0, 1, 1], [], []>} : vector<8x16xbf16>, vector<16x64xbf16>, vector<8x64xf32> -> vector<8x64xf32>
    %c0_5 = arith.constant 0 : index
    %c0_6 = arith.constant 0 : index
    %c0_7 = arith.constant 0 : index
    %17 = vector.load %arg6[%c0_5, %c0_6, %c0_7] : memref<1x8x128xf32, #tpu.memory_space<vmem>>, vector<1x8x128xf32>
    %18 = vector.shape_cast %17 : vector<1x8x128xf32> to vector<8x128xf32>
    %c0_8 = arith.constant 0 : index
    %c0_9 = arith.constant 0 : index
    %c0_10 = arith.constant 0 : index
    %19 = vector.load %arg5[%c0_8, %c0_9, %c0_10] : memref<1x64x128xf32, #tpu.memory_space<vmem>>, vector<1x64x128xf32>
    %20 = vector.shape_cast %19 : vector<1x64x128xf32> to vector<64x128xf32>
    %cst_11 = arith.constant dense<0.000000e+00> : vector<8x128xf32>
    %21 = tpu.matmul %16, %20, %cst_11 {dimension_numbers = #tpu.dot_dimension_numbers<[1], [0], [0], [1], [0, 0, 1, 1], [], []>} : vector<8x64xf32>, vector<64x128xf32>, vector<8x128xf32> -> vector<8x128xf32>
    %22 = arith.addf %18, %21 : vector<8x128xf32>
    %c0_12 = arith.constant 0 : index
    %c0_13 = arith.constant 0 : index
    %c0_14 = arith.constant 0 : index
    %23 = vector.load %arg6[%c0_12, %c0_13, %c0_14] : memref<1x8x128xf32, #tpu.memory_space<vmem>>, vector<1x8x128xf32>
    %24 = vector.shape_cast %23 : vector<1x8x128xf32> to vector<8x128xf32>
    %25 = vector.shape_cast %22 : vector<8x128xf32> to vector<1x8x128xf32>
    tpu.vector_store %arg6[%c0_12, %c0_13, %c0_14], %25 {strides = array<i32>} : memref<1x8x128xf32, #tpu.memory_space<vmem>>, vector<1x8x128xf32>,
    return
  }
  func.func @transform_0(%arg0: i32, %arg1: i32) -> (i32, i32, i32) {
    %c0_i32 = arith.constant 0 : i32
    %c0_i32_0 = arith.constant 0 : i32
    %c0_i32_1 = arith.constant 0 : i32
    return %arg0, %c0_i32, %c0_i32_0 : i32, i32, i32
  }
  func.func @transform_1(%arg0: i32, %arg1: i32) -> (i32, i32, i32) {
    %c0_i32 = arith.constant 0 : i32
    %c0_i32_0 = arith.constant 0 : i32
    %c0_i32_1 = arith.constant 0 : i32
    return %arg0, %c0_i32, %c0_i32_0 : i32, i32, i32
  }
  func.func @transform_2(%arg0: i32, %arg1: i32) -> (i32, i32, i32) {
    %c0_i32 = arith.constant 0 : i32
    %c0_i32_0 = arith.constant 0 : i32
    %c0_i32_1 = arith.constant 0 : i32
    return %arg0, %c0_i32, %c0_i32_0 : i32, i32, i32
  }
  func.func @transform_3(%arg0: i32, %arg1: i32) -> (i32, i32, i32) {
    %c0_i32 = arith.constant 0 : i32
    %c0_i32_0 = arith.constant 0 : i32
    return %arg0, %arg1, %c0_i32 : i32, i32, i32
  }
  func.func @transform_4(%arg0: i32, %arg1: i32) -> (i32, i32, i32) {
    %c0_i32 = arith.constant 0 : i32
    %c0_i32_0 = arith.constant 0 : i32
    %c0_i32_1 = arith.constant 0 : i32
    return %arg0, %c0_i32, %c0_i32_0 : i32, i32, i32
  }
}

</mosaic_0001>

<bundles_post_ra>
// kernel: merged_embeddingbag_sgd_forward.1
= control target key start
LH: loop header
LB: loop body
LE: loop exit
PB: predicated region body
PF: predicated region fallthrough
CT: control target
= control target key end

     0   :  { %9 = vsyncpa [#allocation4], 0  ;;  %s974_s0 = inlined_call_operand.vmem [shape: s32[3,16,1], index: 0, kind: input, shape index: {}]   ;;  %s975_s1 = inlined_call_operand.vmem [shape: s32[3,8,1], index: 1, kind: input, shape index: {}]   ;;  %s976_s2 = inlined_call_operand.vmem [shape: s32[3,8,1], index: 2, kind: input, shape index: {}]   ;;  %s977_s3 = inlined_call_operand.hbm [shape: f32[3,64,128], index: 3, kind: input, shape index: {}]   ;;  %s978_s4 = inlined_call_operand.vmem [shape: f32[3,8,128], index: 4, kind: output, shape index: {}]  }
   0x1   :  { %11 = vsyncpa [#allocation4 + $0x1], 0  ;;  %s826_s15 = smov 0   ;;  %s828_s16 = smov 0  }
   0x2   :  { %s830_s17 = smov 0   ;;  %s832_s18 = smov 0  }
   0x3   :  { %s834_s19 = smov 0   ;;  %s836_s20 = smov 0  }
   0x4 LB: > { %s574_s21 = sadd.s32 4294967295, %s791_s20   ;;  %s29_s22 = sadd.s32 1, %s787_s19  ;;  %s791_s20 = sphi %s836_s20, %s17_s20   ;;  %s787_s19 = sphi %s834_s19, %s986_s19   ;;  %s783_s18 = sphi %s832_s18, %s985_s18   ;;  %s779_s17 = sphi %s830_s17, %s984_s17   ;;  %s775_s16 = sphi %s828_s16, %s983_s16   ;;  %s771_s15 = sphi %s826_s15, %s982_s15  }
   0x5   : > { %p31_p0 = scmp.ge.s32.totalorder %s29_s22, 3  ;;  %s116_s23 = sadd.s32 1, %s779_s17 }
   0x6   : > { %p123_p1 = scmp.ne.s32.totalorder %s779_s17, %s775_s16  ;;  %p124_p2 = scmp.eq.s32.totalorder %s791_s20, 0 }
   0x7   : > { %s988_s22 = smov (%p31_p0, %s29_s22), 0  ;;  %p129_p4 = scmp.ne.s32.totalorder %s775_s16, %s771_s15 }
   0x8   : > { %p862_p3 = por %p124_p2, %p123_p1  ;;  %s111_s25 = ssub.s32 %s787_s19, %s988_s22 }
   0x9   : > { %p130_p5 = scmp.eq.s32.totalorder %s574_s21, 0  ;;  %p114_p6 = scmp.eq.s32.totalorder %s111_s25, 0 }
   0xa   : > { %p653_p8 = scmp.lt.s32.totalorder %s791_s20, 3  ;;  %s201_s28 = sand.u32 1, %s779_s17  }
   0xb   : > { %p869_p7 = por %p130_p5, %p129_p4  ;;  %s597_s29 = sshll.u32 %s787_s19, 10 }
   0xc   : > { %s875_s27 = scalar_select %p114_p6, %s779_s17, %s116_s23  }
   0xd   : > { %s578_s30 = sshll.u32 %s201_s28, 6  ;;  %s882_s7 = scalar_lea.hbm %s977_s3, %s597_s29 }
   0xe   : > { %s205_s8 = scalar_lea.vmem [#allocation3], %s578_s30  ;;  %p886_p9 = pnand %p653_p8, %p862_p3 }
   0xf   : > { %s214_s9 = sshll.u32 %s205_s8, 4  ;;  %s892_s11 = scalar_lea.sflag [#allocation4], %s201_s28  ;;  %s890_s9 = int_to_ptr.vmem [resolvable:$true] %s214_s9 }
  0x10   : > { %s711_s12 = scalar_lea.hbm %s882_s7, 1024  ;;  %p713_p11 = pneg %p886_p9 }
  0x11   : > { %p712_p10 = scmp.ne.s32.totalorder %s882_s7, %s711_s12  ;;  %s716_s15 = scalar_lea.hbm %s977_s3, 3072 }
  0x12   : > { %p717_p0 = scmp.lt.u32.totalorder %s882_s7, %s977_s3  ;;  %p718_p1 = scmp.lt.u32.totalorder %s716_s15, %s711_s12 }
  0x13   : > { %p714_p12 = pnand %p713_p11, %p712_p10  ;;  %p720_p3 = scmp.lt.u32.totalorder %s711_s12, %s882_s7 }
  0x14   : > { %p719_p2 = por %p718_p1, %p717_p0 }
  0x15   : > { %p715_p13 = pneg %p714_p12 }
  0x16   : > { %p721_p4 = por %p720_p3, %p719_p2 }
  0x18   : > { %p722_p5 = pnand %p721_p4, %p715_p13 }
  0x1a   : > { %725 = shalt.err (!%p722_p5)
}
  0x1b   : > { %s726_s24 = scalar_lea.vmem %s890_s9, 1024  ;;  %s793_s25 = smov [#allocation3]  }
  0x1c   : > { %p727_p6 = scmp.ne.s32.totalorder %s890_s9, %s726_s24  ;;  %s731_s28 = sshll.u32 %s793_s25, 4  ;;  %s732_s28 = int_to_ptr.vmem [resolvable:$false] %s731_s28 }
  0x1d   : > { %s733_s29 = scalar_lea.vmem %s732_s28, 2048  ;;  %p734_p12 = scmp.lt.s32.totalorder %s890_s9, %s732_s28 }
  0x1e   : > { %p729_p8 = pnand %p727_p6, %p713_p11  ;;  %p735_p0 = scmp.lt.s32.totalorder %s733_s29, %s726_s24 }
  0x20   : > { %p730_p10 = pneg %p729_p8  ;;  %p736_p1 = por %p735_p0, %p734_p12 }
  0x22   : > { %p737_p2 = pnand %p736_p1, %p730_p10 }
  0x24   : > { %740 = shalt.err (!%p737_p2)
}
  0x25   : > { %s794_s30 = smov 128   ;;  %s795_s5 = smov 8  }
  0x26   : > { %652 = dma.hbm_to_vmem [thread:$0]  (!%p886_p9), %s882_s7, 1024, %s890_s9, %s892_s11, %s794_s30, %s794_s30, %s795_s5  }
  0x27   : > { %p581_p11 = scmp.ge.s32.totalorder %s791_s20, 1  ;;  %p222_p13 = scmp.lt.s32.totalorder %s791_s20, 4 }
  0x29   : > { %p223_p3 = pnand %p581_p11, %p222_p13 }
  0x2a   : > { %s228_s6 = sand.u32 (!%p223_p3), 1, %s775_s16  }
  0x2b   : > { %226 = sbr.rel (%p223_p3) target bundleno = 627 (0x273), region = 36  ;;  %s582_s8 = sshll.u32 (!%p223_p3), %s228_s6, 6 }
  0x2c   : > { %s229_s12 = scalar_lea.sflag (!%p223_p3), [#allocation4], %s228_s6  ;;  %s923_s13 = scalar_lea.vmem (!%p223_p3), [#allocation3], %s582_s8 }
  0x32   : > { %766 = dma.done.wait (%p869_p7), %s229_s12, 1024  }
  0x33   : > { %768 = vsyncadd (%p869_p7), %s229_s12, 4294966272  ;;  %p269_p4 = scmp.lt.s32.totalorder %s783_s18, 2  ;;  %v796_v0 = vmov 0   ;;  %v797_v5 = vmov 0.0   ;;  %vm798_vm0 = vmmov 0   ;;  %v378_v6 = vld [vmem:[%s923_s13] sm:$0xff]  ;;  %v293_v19 = vlaneseq }
  0x34   : > { %709 = vset.pattern.permute.xlu0 %v796_v0  ;;  %710 = vset.pattern.permute.xlu1 %v796_v0  ;;  %v379_v7 = vld [vmem:[%s923_s13 + $0x8] sm:$0xff]  ;;  %v380_v8 = vld [vmem:[%s923_s13 + $0x10] sm:$0xff]  ;;  %v799_v9 = vmov 0.0|0.0   ;;  %v381_v11 = vld [vmem:[%s923_s13 + $0x18] sm:$0xff]  ;;  %vm308_vm5 = vcmask 130048   ;;  %vm386_vm8 = vcmask 523264  }
  0x35   : > { %s990_s18 = smov (!%p269_p4, %s783_s18), 2  ;;  %610 = vmatprep.subr.bf16.mxu0 %v797_v5  ;;  %612 = vmatprep.mubr.msk.bf16.mxu0 %vm798_vm0, %v797_v5  ;;  %v636_v10 = vpack.c.bf16 %v379_v7, %v378_v6  ;;  %v639_v12 = vpack.c.bf16 %v381_v11, %v380_v8  ;;  %v382_v13 = vld [vmem:[%s923_s13 + $0x20] sm:$0xff]  ;;  %v383_v14 = vld [vmem:[%s923_s13 + $0x28] sm:$0xff]  ;;  %v384_v16 = vld [vmem:[%s923_s13 + $0x30] sm:$0xff]  ;;  %v294_v22 = vand.u32 127, %v293_v19 }
  0x36   : > { %s931_s7 = sshll.u32 %s990_s18, 3  ;;  %s598_s9 = sshll.u32 %s990_s18, 4  ;;  %632 = vmatprep.mubr.msk.f32.mxu1 %vm798_vm0, %v797_v5  ;;  %635 = vmatprep.subr.bf16.mxu1 %v799_v9  ;;  %v642_v15 = vpack.c.bf16 %v383_v14, %v382_v13  ;;  %v385_v17 = vld [vmem:[%s923_s13 + $0x38] sm:$0xff]  ;;  %v800_v26 = vmov 1.0|1.0  }
  0x37   : > { %s277_s14 = scalar_lea.vmem %s975_s1, %s931_s7  ;;  %s273_s26 = scalar_lea.vmem %s974_s0, %s598_s9  ;;  %637 = vmatpush3.bf16.msra.mxu1 %v636_v10  ;;  %v645_v18 = vpack.c.bf16 %v385_v17, %v384_v16 }
  0x38   : > { %s281_s25 = scalar_lea.vmem %s976_s2, %s931_s7  ;;  %v295_v1 = vld [vmem:[%s277_s14] sm:$0xff]  ;;  %v311_v4 = vld [vmem:[%s273_s26 + $0x8] sm:$0xff]  ;;  %638 = vmatprep.subr.bf16.mxu1 %v799_v9  ;;  %s286_s29 = scalar_lea.vmem %s978_s4, %s931_s7 }
  0x39   : > { %v310_v2 = vld [vmem:[%s273_s26] sm:$0xff]  ;;  %297 = vperm.xlu0 %709, %v295_v1  }
  0x3a   : > { %319 = vperm.xlu1 %710, %v310_v2   ;;  %v300_v3 = vld [vmem:[%s281_s25] sm:$0xff] }
  0x3b   : > { %640 = vmatpush3.bf16.msra.mxu1 %v639_v12 }
  0x3c   : > { %641 = vmatprep.subr.bf16.mxu1 %v799_v9 }
  0x3d   : > { %302 = vperm.xlu0 %709, %v300_v3  }
  0x3e   : > { %322 = vperm.xlu1 %710, %v311_v4  }
  0x3f   : > { %643 = vmatpush3.bf16.msra.mxu1 %v642_v15 }
  0x40   : > { %644 = vmatprep.subr.bf16.mxu1 %v799_v9 }
  0x43   : > { %646 = vmatpush3.bf16.msra.mxu1 %v645_v18 }
  0xb8   : > { %v298_v20 = vpop.permute.xlu0 %297 }
  0xb9   : > { %v320_v21 = vpop.permute.xlu1 %319  ;;  %vm299_vm2 = vcmp.ge.s32.totalorder %v294_v22, %v298_v20 }
  0xba   : > { %vm324_vm1 = vcmp.eq.s32.totalorder %v294_v22, %v320_v21 }
  0xbc   : > { %v303_v23 = vpop.permute.xlu0 %302 }
  0xbd   : > { %v323_v24 = vpop.permute.xlu1 %322  ;;  %vm304_vm3 = vcmp.lt.s32.totalorder %v294_v22, %v303_v23 }
  0xbe   : > { %vm325_vm4 = vcmp.eq.s32.totalorder %v294_v22, %v323_v24  ;;  %vm305_vm6 = vmand %vm299_vm2, %vm304_vm3 }
  0xbf   : > { %v588_v25 = vsel %vm305_vm6, 1.0, %v797_v5  ;;  %vm591_vm7 = vmpackc.low %vm325_vm4, %vm324_vm1 }
  0xc0   : > { %611 = vmatpush3.bf16.msk.msra.mxu0 %vm591_vm7, %v800_v26  ;;  %309 = vst.msk [vmem:[#allocation2] sm:$0xff] %vm308_vm5, %v588_v25 }
  0xc7   : > { %v331_v27 = vld [vmem:[#allocation2] sm:$0xff] }
  0xc8   : > { %v332_v28 = vpack.c.bf16 %v331_v27, %v331_v27 }
  0xca   : > { %613 = vmatmul.mubr.msk.bf16.vlgmr.msra.gmra.mrb[0].mxu0 %vm308_vm5, %v332_v28 }
 0x19d   : > { %v371_v29 = vpop.f32.mrb[0].mxu0 }
 0x19e   : > { %v614_v30 = vpop.f32.mrb[1].mxu0  ;;  %633 = vmatmul.mubr.msk.f32.vlgmr.msra.gmra.mrb[0].mxu1 %vm386_vm8, %v371_v29 }
 0x19f   : > { %v374_v31 = vpop.f32.mrb[2].mxu0 }
 0x1a0   : > { %v615_v32 = vpop.f32.mrb[3].mxu0 }
 0x271   : > { %v456_v33 = vpop.f32.mrb[0].mxu1 }
 0x272   : > { %v634_v34 = vpop.f32.mrb[1].mxu1  ;;  %461 = vst [vmem:[%s286_s29] sm:$0xff] %v456_v33 }
 0x273 PF: > { %s17_s20 = sadd.s32 1, %s791_s20   ;;  %s982_s15 = smov %s775_s16 }
 0x274   : > { %p14_p7 = scmp.ge.s32.totalorder %s17_s20, 5   ;;  %s983_s16 = smov %s779_s17 }
 0x275   : > { %s984_s17 = smov %s875_s27  ;;  %s985_s18 = smov %s787_s19 }
 0x276   : > { %s986_s19 = smov %s988_s22  ;;  %16 = sbr.rel (!%p14_p7) target bundleno = 4 (0x4), region = 89 }
 0x27d   :  { %481 = vsyncpa [#allocation4], 1 }
 0x27e   :  { %483 = vsyncpa [#allocation4 + $0x1], 1 }

</bundles_post_ra>
